<compile_context>
chip_gen: v7x
topology: tpu7x:2x2x1
jax: 0.10.0
libtpu: 0.0.40
codegen_flags: <defaults>
</compile_context>

<pallas_src>
import functools

import jax
import jax.numpy as jnp
from jax import lax
from jax.experimental import pallas as pl
from jax.experimental.pallas import tpu as pltpu


_MAX_TR = 8192                 # rows of 128 lanes per input block
_CHUNK_ROWS = 256              # rows per inner fori_loop chunk
_VMEM_LIMIT = 32 * 1024 * 1024  # fits 2 inputs x 2 buffers x 4 MiB (f32, TR=8192)


def _round_down(v, m):
    return (v // m) * m


def _row_align(dtype):
    isz = jnp.dtype(dtype).itemsize
    if isz >= 4:
        return 8
    if isz == 2:
        return 16
    return 32


def _dice_partial_kernel(x_ref, y_ref, o_ref, *, tr, blocks_per_shard,
                         chunk_rows, rows_valid, needs_mask):
    """Accumulates per-lane partial sums into the shard-resident output block.

    o_ref block layout (per shard): (1, 24, 128) f32
      rows  0: 8  -> sum of sigmoid(x) * y
      rows  8:16  -> sum of sigmoid(x)
      rows 16:24  -> sum of y
    """
    c = pl.program_id(0)   # shard ("parallel") axis
    i = pl.program_id(1)   # reduction ("arbitrary") axis

    @pl.when(i == 0)
    def _init():
        o_ref[...] = jnp.zeros_like(o_ref)

    n_chunks = tr // chunk_rows
    g = chunk_rows // 8

    def body(j, carry):
        acc_xy, acc_x, acc_y = carry
        r0 = pl.multiple_of(j * chunk_rows, chunk_rows)
        xv = x_ref[pl.ds(r0, chunk_rows), :].astype(jnp.float32)
        yv = y_ref[pl.ds(r0, chunk_rows), :].astype(jnp.float32)
        if needs_mask:
            # Logical (unclamped) global row of each element; rows past the
            # real array (partial last block / overhang grid steps that were
            # clamped to the last block) contribute exactly zero.
            row0 = (c * blocks_per_shard + i) * tr + r0
            rows_idx = lax.broadcasted_iota(jnp.int32, (chunk_rows, 128), 0) + row0
            valid = rows_idx < rows_valid
            xv = jnp.where(valid, xv, -30.0)   # sigmoid(-30) == 0 exactly (f32)
            yv = jnp.where(valid, yv, 0.0)
        # sigmoid via tanh: one EUP transcendental instead of exp + divide.
        sx = 0.5 * jnp.tanh(0.5 * xv) + 0.5
        prod = sx * yv
        # (chunk,128) -> (chunk/8, 8, 128); axis-0 sum is pure vreg (VPU) adds.
        acc_xy = acc_xy + jnp.sum(prod.reshape(g, 8, 128), axis=0)
        acc_x = acc_x + jnp.sum(sx.reshape(g, 8, 128), axis=0)
        acc_y = acc_y + jnp.sum(yv.reshape(g, 8, 128), axis=0)
        return acc_xy, acc_x, acc_y

    zero = jnp.zeros((8, 128), jnp.float32)
    unroll = 2 if (n_chunks % 2 == 0 and n_chunks >= 2) else 1
    acc_xy, acc_x, acc_y = lax.fori_loop(
        0, n_chunks, body, (zero, zero, zero), unroll=unroll)

    o_ref[0, 0:8, :] += acc_xy
    o_ref[0, 8:16, :] += acc_x
    o_ref[0, 16:24, :] += acc_y


def _jnp_partial_sums(x_flat, y_flat):
    sx = jax.nn.sigmoid(x_flat.astype(jnp.float32))
    yv = y_flat.astype(jnp.float32)
    return jnp.sum(sx * yv), jnp.sum(sx), jnp.sum(yv)


def dice_score(x: jax.Array, y: jax.Array, smooth: float = 1.0) -> jax.Array:
    """Pallas TPU implementation of DiceScore.forward. Returns a scalar f32."""
    assert x.shape == y.shape, "x and y must have the same shape"
    n = x.size

    x_flat = jnp.ravel(x)
    y_flat = jnp.ravel(y)
    smooth = jnp.float32(smooth)

    align = max(_row_align(x.dtype), _row_align(y.dtype))

    # Tiny inputs: pipeline overhead dominates -> plain jnp.
    if n < 2 * align * 128:
        inter, xs, ys = _jnp_partial_sums(x_flat, y_flat)
        return (2.0 * inter + smooth) / (xs + ys + smooth)

    # Lane padding only for ragged n (one copy); aligned shapes reshape for
    # free (no HBM->HBM copy). Pad values are sigmoid/sum neutral.
    rem = n % 128
    if rem:
        pad = 128 - rem
        x_flat = jnp.concatenate(
            [x_flat, jnp.full((pad,), -30.0, dtype=x_flat.dtype)])
        y_flat = jnp.concatenate(
            [y_flat, jnp.zeros((pad,), dtype=y_flat.dtype)])
    rows = x_flat.size // 128
    x2 = x_flat.reshape(rows, 128)
    y2 = y_flat.reshape(rows, 128)

    # Block size: as large as the raised VMEM budget allows, but small enough
    # that medium inputs still give 2 shards x >=2 pipeline steps each
    # (keeps both v7x TensorCores busy and DMA double-buffered).
    tr = min(_MAX_TR, max(_round_down(rows // 4, align), align))

    num_blocks = -(-rows // tr)                        # cdiv
    num_shards = 2 if num_blocks >= 2 else 1
    blocks_per_shard = -(-num_blocks // num_shards)    # cdiv
    needs_mask = (rows % tr != 0) or (num_shards * blocks_per_shard != num_blocks)
    last_block = num_blocks - 1

    chunk_rows = min(_CHUNK_ROWS, tr)
    while tr % chunk_rows != 0:
        chunk_rows //= 2

    def in_index_map(c, i):
        b = c * blocks_per_shard + i
        # Clamp so overhang grid steps re-read the last real block; their
        # contribution is zeroed by the row mask inside the kernel.
        return (jnp.minimum(b, last_block), 0)

    kernel = functools.partial(
        _dice_partial_kernel,
        tr=tr,
        blocks_per_shard=blocks_per_shard,
        chunk_rows=chunk_rows,
        rows_valid=rows,
        needs_mask=needs_mask,
    )

    n_elems = rows * 128
    cost = pl.CostEstimate(
        flops=6 * n_elems,
        transcendentals=n_elems,
        bytes_accessed=n_elems * (x2.dtype.itemsize + y2.dtype.itemsize)
        + num_shards * 24 * 128 * 4,
    )

    out = pl.pallas_call(
        kernel,
        out_shape=jax.ShapeDtypeStruct((num_shards, 24, 128), jnp.float32),
        grid_spec=pltpu.PrefetchScalarGridSpec(
            num_scalar_prefetch=0,
            grid=(num_shards, blocks_per_shard),
            in_specs=[
                pl.BlockSpec((tr, 128), in_index_map),
                pl.BlockSpec((tr, 128), in_index_map),
            ],
            out_specs=pl.BlockSpec((1, 24, 128), lambda c, i: (c, 0, 0)),
        ),
        compiler_params=pltpu.CompilerParams(
            dimension_semantics=("parallel", "arbitrary"),
            vmem_limit_bytes=_VMEM_LIMIT,
        ),
        cost_estimate=cost,
    )(x2, y2)

    parts = out.reshape(num_shards, 3, 8, 128)
    inter = jnp.sum(parts[:, 0])
    xs = jnp.sum(parts[:, 1])
    ys = jnp.sum(parts[:, 2])
    return (2.0 * inter + smooth) / (xs + ys + smooth)


def _dice_score_ref(x, y, smooth=1.0):
    sx = jax.nn.sigmoid(x.astype(jnp.float32)).ravel()
    yf = y.astype(jnp.float32).ravel()
    inter = jnp.sum(sx * yf)
    return (2.0 * inter + smooth) / (jnp.sum(sx) + jnp.sum(yf) + smooth)


if __name__ == "__main__":
    key = jax.random.PRNGKey(0)

    # Case 1: small NCHW segmentation-style shape (2 shards x 1 block).
    k1, k2, key = jax.random.split(key, 3)
    x1 = jax.random.normal(k1, (2, 4, 16, 16), dtype=jnp.float32)            # logits
    y1 = (jax.random.uniform(k2, (2, 4, 16, 16)) > 0.5).astype(jnp.float32)  # mask
    out1 = dice_score(x1, y1, smooth=1.0)
    jax.block_until_ready(out1)
    ref1 = _dice_score_ref(x1, y1, smooth=1.0)
    assert jnp.allclose(out1, ref1, atol=1e-5, rtol=1e-5), (out1, ref1)

    # Case 2: multi-block pipelined path (2 shards x 2 blocks, no masking).
    k1, k2, key = jax.random.split(key, 3)
    x2 = jax.random.normal(k1, (2, 8, 128, 128), dtype=jnp.float32)
    y2 = (jax.random.uniform(k2, (2, 8, 128, 128)) > 0.5).astype(jnp.float32)
    out2 = dice_score(x2, y2, smooth=1.0)
    jax.block_until_ready(out2)
    ref2 = _dice_score_ref(x2, y2, smooth=1.0)
    assert jnp.allclose(out2, ref2, atol=1e-5, rtol=1e-5), (out2, ref2)

    # Case 3: ragged bf16 shape -> lane padding + partial/overhang block masking.
    k1, k2, key = jax.random.split(key, 3)
    x3 = jax.random.normal(k1, (3, 5, 100, 77), dtype=jnp.bfloat16)
    y3 = (jax.random.uniform(k2, (3, 5, 100, 77)) > 0.5).astype(jnp.bfloat16)
    out3 = dice_score(x3, y3, smooth=1.0)
    jax.block_until_ready(out3)
    ref3 = _dice_score_ref(x3, y3, smooth=1.0)
    assert jnp.allclose(out3, ref3, atol=1e-4, rtol=1e-4), (out3, ref3)

    print("KERNEL_OK")
</pallas_src>

<mosaic_0001>
module attributes {stable_mosaic.version = 11 : i64} {
  func.func @_dice_partial_kernel(%arg0: i32, %arg1: i32, %arg2: memref<8x128xf32, #tpu.memory_space<vmem>>, %arg3: memref<8x128xf32, #tpu.memory_space<vmem>>, %arg4: memref<1x24x128xf32, #tpu.memory_space<vmem>>) attributes {dimension_semantics = [#tpu.dimension_semantics<parallel>, #tpu.dimension_semantics<arbitrary>], iteration_bounds = array<i64: 2, 1>, scalar_prefetch = 0 : i64, scratch_operands = 0 : i64, tpu.core_type = #tpu.core_type<tc>, window_params = [{transform_indices = @transform_0, window_bounds = array<i64: 8, 128>}, {transform_indices = @transform_1, window_bounds = array<i64: 8, 128>}, {transform_indices = @transform_2, window_bounds = array<i64: 1, 24, 128>}]} {
    %c0_i32 = arith.constant 0 : i32
    %0 = arith.cmpi eq, %arg1, %c0_i32 : i32
    %1 = arith.extui %0 : i1 to i32
    %c0_i32_0 = arith.constant 0 : i32
    %2 = arith.cmpi ne, %1, %c0_i32_0 : i32
    scf.if %2 {
      %cst_25 = arith.constant 0.000000e+00 : f32
      %45 = vector.broadcast %cst_25 : f32 to vector<1x24x128xf32>
      %c0_26 = arith.constant 0 : index
      %c0_27 = arith.constant 0 : index
      %c0_28 = arith.constant 0 : index
      %46 = vector.load %arg4[%c0_26, %c0_27, %c0_28] : memref<1x24x128xf32, #tpu.memory_space<vmem>>, vector<1x24x128xf32>
      tpu.vector_store %arg4[%c0_26, %c0_27, %c0_28], %45 {strides = array<i32>} : memref<1x24x128xf32, #tpu.memory_space<vmem>>, vector<1x24x128xf32>,
    } else {
    }
    %cst = arith.constant 0.000000e+00 : f32
    %3 = vector.broadcast %cst : f32 to vector<8x128xf32>
    %c0_i32_1 = arith.constant 0 : i32
    %c8_i32 = arith.constant 8 : i32
    %4 = arith.muli %c0_i32_1, %c8_i32 : i32
    %5 = tpu.assume_multiple %4, 8 : i32
    %6 = arith.index_cast %5 : i32 to index
    %c0 = arith.constant 0 : index
    %7 = vector.load %arg2[%6, %c0] : memref<8x128xf32, #tpu.memory_space<vmem>>, vector<8x128xf32>
    %8 = arith.index_cast %5 : i32 to index
    %c0_2 = arith.constant 0 : index
    %9 = vector.load %arg3[%8, %c0_2] : memref<8x128xf32, #tpu.memory_space<vmem>>, vector<8x128xf32>
    %cst_3 = arith.constant 5.000000e-01 : f32
    %10 = vector.broadcast %cst_3 : f32 to vector<8x128xf32>
    %11 = arith.mulf %10, %7 : vector<8x128xf32>
    %12 = math.tanh %11 : vector<8x128xf32>
    %cst_4 = arith.constant 5.000000e-01 : f32
    %13 = vector.broadcast %cst_4 : f32 to vector<8x128xf32>
    %14 = arith.mulf %13, %12 : vector<8x128xf32>
    %cst_5 = arith.constant 5.000000e-01 : f32
    %15 = vector.broadcast %cst_5 : f32 to vector<8x128xf32>
    %16 = arith.addf %14, %15 : vector<8x128xf32>
    %17 = arith.mulf %16, %9 : vector<8x128xf32>
    %18 = vector.shape_cast %17 : vector<8x128xf32> to vector<1x8x128xf32>
    %cst_6 = arith.constant dense<0.000000e+00> : vector<8x128xf32>
    %19 = vector.multi_reduction <add>, %18, %cst_6 [0] : vector<1x8x128xf32> to vector<8x128xf32>
    %20 = arith.addf %3, %19 : vector<8x128xf32>
    %21 = vector.shape_cast %16 : vector<8x128xf32> to vector<1x8x128xf32>
    %cst_7 = arith.constant dense<0.000000e+00> : vector<8x128xf32>
    %22 = vector.multi_reduction <add>, %21, %cst_7 [0] : vector<1x8x128xf32> to vector<8x128xf32>
    %23 = arith.addf %3, %22 : vector<8x128xf32>
    %24 = vector.shape_cast %9 : vector<8x128xf32> to vector<1x8x128xf32>
    %cst_8 = arith.constant dense<0.000000e+00> : vector<8x128xf32>
    %25 = vector.multi_reduction <add>, %24, %cst_8 [0] : vector<1x8x128xf32> to vector<8x128xf32>
    %26 = arith.addf %3, %25 : vector<8x128xf32>
    %c1_i32 = arith.constant 1 : i32
    %c0_9 = arith.constant 0 : index
    %c0_10 = arith.constant 0 : index
    %c0_11 = arith.constant 0 : index
    %27 = vector.load %arg4[%c0_9, %c0_10, %c0_11] : memref<1x24x128xf32, #tpu.memory_space<vmem>>, vector<1x8x128xf32>
    %28 = vector.shape_cast %27 : vector<1x8x128xf32> to vector<8x128xf32>
    %29 = arith.addf %28, %20 : vector<8x128xf32>
    %c0_12 = arith.constant 0 : index
    %c0_13 = arith.constant 0 : index
    %c0_14 = arith.constant 0 : index
    %30 = vector.load %arg4[%c0_12, %c0_13, %c0_14] : memref<1x24x128xf32, #tpu.memory_space<vmem>>, vector<1x8x128xf32>
    %31 = vector.shape_cast %30 : vector<1x8x128xf32> to vector<8x128xf32>
    %32 = vector.shape_cast %29 : vector<8x128xf32> to vector<1x8x128xf32>
    tpu.vector_store %arg4[%c0_12, %c0_13, %c0_14], %32 {strides = array<i32>} : memref<1x24x128xf32, #tpu.memory_space<vmem>>, vector<1x8x128xf32>,
    %c0_15 = arith.constant 0 : index
    %c8 = arith.constant 8 : index
    %c0_16 = arith.constant 0 : index
    %33 = vector.load %arg4[%c0_15, %c8, %c0_16] : memref<1x24x128xf32, #tpu.memory_space<vmem>>, vector<1x8x128xf32>
    %34 = vector.shape_cast %33 : vector<1x8x128xf32> to vector<8x128xf32>
    %35 = arith.addf %34, %23 : vector<8x128xf32>
    %c0_17 = arith.constant 0 : index
    %c8_18 = arith.constant 8 : index
    %c0_19 = arith.constant 0 : index
    %36 = vector.load %arg4[%c0_17, %c8_18, %c0_19] : memref<1x24x128xf32, #tpu.memory_space<vmem>>, vector<1x8x128xf32>
    %37 = vector.shape_cast %36 : vector<1x8x128xf32> to vector<8x128xf32>
    %38 = vector.shape_cast %35 : vector<8x128xf32> to vector<1x8x128xf32>
    tpu.vector_store %arg4[%c0_17, %c8_18, %c0_19], %38 {strides = array<i32>} : memref<1x24x128xf32, #tpu.memory_space<vmem>>, vector<1x8x128xf32>,
    %c0_20 = arith.constant 0 : index
    %c16 = arith.constant 16 : index
    %c0_21 = arith.constant 0 : index
    %39 = vector.load %arg4[%c0_20, %c16, %c0_21] : memref<1x24x128xf32, #tpu.memory_space<vmem>>, vector<1x8x128xf32>
    %40 = vector.shape_cast %39 : vector<1x8x128xf32> to vector<8x128xf32>
    %41 = arith.addf %40, %26 : vector<8x128xf32>
    %c0_22 = arith.constant 0 : index
    %c16_23 = arith.constant 16 : index
    %c0_24 = arith.constant 0 : index
    %42 = vector.load %arg4[%c0_22, %c16_23, %c0_24] : memref<1x24x128xf32, #tpu.memory_space<vmem>>, vector<1x8x128xf32>
    %43 = vector.shape_cast %42 : vector<1x8x128xf32> to vector<8x128xf32>
    %44 = vector.shape_cast %41 : vector<8x128xf32> to vector<1x8x128xf32>
    tpu.vector_store %arg4[%c0_22, %c16_23, %c0_24], %44 {strides = array<i32>} : memref<1x24x128xf32, #tpu.memory_space<vmem>>, vector<1x8x128xf32>,
    return
  }
  func.func @transform_0(%arg0: i32, %arg1: i32) -> (i32, i32) {
    %c1_i32 = arith.constant 1 : i32
    %0 = arith.muli %arg0, %c1_i32 : i32
    %1 = arith.addi %0, %arg1 : i32
    %c1_i32_0 = arith.constant 1 : i32
    %2 = arith.minsi %1, %c1_i32_0 : i32
    %c0_i32 = arith.constant 0 : i32
    %c0_i32_1 = arith.constant 0 : i32
    return %2, %c0_i32 : i32, i32
  }
  func.func @transform_1(%arg0: i32, %arg1: i32) -> (i32, i32) {
    %c1_i32 = arith.constant 1 : i32
    %0 = arith.muli %arg0, %c1_i32 : i32
    %1 = arith.addi %0, %arg1 : i32
    %c1_i32_0 = arith.constant 1 : i32
    %2 = arith.minsi %1, %c1_i32_0 : i32
    %c0_i32 = arith.constant 0 : i32
    %c0_i32_1 = arith.constant 0 : i32
    return %2, %c0_i32 : i32, i32
  }
  func.func @transform_2(%arg0: i32, %arg1: i32) -> (i32, i32, i32) {
    %c0_i32 = arith.constant 0 : i32
    %c0_i32_0 = arith.constant 0 : i32
    %c0_i32_1 = arith.constant 0 : i32
    return %arg0, %c0_i32, %c0_i32_0 : i32, i32, i32
  }
}

</mosaic_0001>

<bundles_post_ra>
// kernel: tpu_custom_call.1
= control target key start
LH: loop header
LB: loop body
LE: loop exit
PB: predicated region body
PF: predicated region fallthrough
CT: control target
= control target key end

     0   :  { %7 = vsyncpa [#allocation3], 0  ;;  %s937_s0 = inlined_call_operand.hbm [shape: f32[16,128], index: 0, kind: input, shape index: {}]   ;;  %s938_s1 = inlined_call_operand.hbm [shape: f32[16,128], index: 1, kind: input, shape index: {}]   ;;  %s939_s2 = inlined_call_operand.hbm [shape: f32[2,24,128], index: 2, kind: output, shape index: {}]  }
   0x1   :  { %9 = vsyncpa [#allocation3 + $0x1], 0 }
   0x2   :  { %10 = vsyncpa [#allocation6], 0 }
   0x3   :  { %12 = vsyncpa [#allocation6 + $0x1], 0 }
   0x4   :  { %13 = vsyncpa [#allocation4], 0 }
   0x5   :  { %15 = vsyncpa [#allocation4 + $0x1], 0  ;;  %s683_s9 = smov 0   ;;  %s685_s10 = smov 0  }
   0x6   :  { %s687_s11 = smov 0   ;;  %s689_s12 = smov 0  }
   0x7   :  { %s691_s13 = smov 0   ;;  %s693_s14 = smov 0  }
   0x8   :  { %s695_s15 = smov 0   ;;  %s697_s16 = smov 0  }
   0x9   :  { %s699_s17 = smov 0  }
   0xa LB: > { %s379_s18 = sadd.s32 4294967295, %s661_s17   ;;  %s380_s19 = sadd.s32 4294967294, %s661_s17   ;;  %s661_s17 = sphi %s699_s17, %s21_s17   ;;  %s657_s16 = sphi %s697_s16, %s964_s16   ;;  %s653_s15 = sphi %s695_s15, %s963_s15   ;;  %s649_s14 = sphi %s693_s14, %s962_s14   ;;  %s645_s13 = sphi %s691_s13, %s961_s13   ;;  %s641_s12 = sphi %s689_s12, %s960_s12   ;;  %s637_s11 = sphi %s687_s11, %s959_s11   ;;  %s633_s10 = sphi %s685_s10, %s958_s10   ;;  %s629_s9 = sphi %s683_s9, %s957_s9  }
   0xb   : > { %s33_s20 = sadd.s32 1, %s657_s16  ;;  %p38_p0 = scmp.lt.s32.totalorder %s657_s16, 1 }
   0xc   : > { %p35_p1 = scmp.ge.s32.totalorder %s33_s20, 2  ;;  %s46_s21 = sadd.s32 1, %s649_s14 }
   0xd   : > { %s732_s22 = scalar_select %p38_p0, %s657_s16, 1 }
   0xe   : > { %s966_s20 = smov (%p35_p1, %s33_s20), 0  ;;  %p53_p2 = scmp.ne.s32.totalorder %s649_s14, %s645_s13 }
   0xf   : > { %p54_p3 = scmp.eq.s32.totalorder %s661_s17, 0  ;;  %p41_p4 = scmp.lt.s32.totalorder %s966_s20, 1 }
  0x10   : > { %p59_p5 = scmp.ne.s32.totalorder %s645_s13, %s641_s12  ;;  %p60_p7 = scmp.eq.s32.totalorder %s379_s18, 0 }
  0x11   : > { %p741_p6 = por %p54_p3, %p53_p2  ;;  %s101_s26 = ssub.s32 %s657_s16, %s966_s20 }
  0x12   : > { %s42_s24 = scalar_select %p41_p4, %s966_s20, 1 }
  0x13   : > { %p746_p8 = por %p60_p7, %p59_p5  ;;  %p102_p9 = scmp.eq.s32.totalorder %s101_s26, 0 }
  0x14   : > { %s43_s27 = ssub.s32 %s732_s22, %s42_s24  ;;  %s104_s28 = sadd.s32 1, %s637_s11 }
  0x15   : > { %s944_s25 = scalar_select %p746_p8, 1, 0 }
  0x16   : > { %p44_p10 = scmp.eq.s32.totalorder %s43_s27, 0  ;;  %p114_p11 = scmp.ne.s32.totalorder %s637_s11, %s633_s10 }
  0x17   : > { %s755_s29 = scalar_select %p102_p9, %s637_s11, %s104_s28  }
  0x18   : > { %s758_s30 = scalar_select %p44_p10, %s649_s14, %s46_s21  }
  0x19   : > { %p115_p12 = scmp.eq.s32.totalorder %s379_s18, 1  ;;  %p120_p13 = scmp.ne.s32.totalorder %s633_s10, %s629_s9 }
  0x1a   : > { %p121_p0 = scmp.eq.s32.totalorder %s380_s19, 1  ;;  %p412_p4 = scmp.lt.s32.totalorder %s661_s17, 2 }
  0x1b   : > { %p764_p1 = por %p115_p12, %p114_p11  ;;  %s775_s5 = sand.u32 1, %s649_s14  }
  0x1c   : > { %p769_p3 = por %p121_p0, %p120_p13  ;;  %s384_s6 = sshll.u32 %s732_s22, 7 }
  0x1d   : > { %s945_s3 = scalar_select %p764_p1, 1, 0 }
  0x1e   : > { %s946_s4 = scalar_select %p769_p3, 1, 0 }
  0x1f   : > { %s940_s7 = sshll.u32 %s775_s5, 3  ;;  %s784_s18 = scalar_lea.hbm %s937_s0, %s384_s6 }
  0x20   : > { %s145_s19 = scalar_lea.vmem [#allocation2], %s940_s7  ;;  %p790_p5 = pnand %p412_p4, %p741_p6 }
  0x21   : > { %s155_s21 = sshll.u32 %s145_s19, 4  ;;  %s142_s26 = scalar_lea.sflag [#allocation3], %s775_s5  ;;  %s794_s21 = int_to_ptr.vmem [resolvable:$true] %s155_s21 }
  0x22   : > { %s491_s27 = scalar_lea.hbm %s784_s18, 128  ;;  %p493_p11 = pneg %p790_p5 }
  0x23   : > { %p492_p10 = scmp.ne.s32.totalorder %s784_s18, %s491_s27  ;;  %s496_s8 = scalar_lea.hbm %s937_s0, 256 }
  0x24   : > { %p497_p6 = scmp.lt.u32.totalorder %s784_s18, %s937_s0  ;;  %p498_p0 = scmp.lt.u32.totalorder %s496_s8, %s491_s27 }
  0x25   : > { %p494_p12 = pnand %p493_p11, %p492_p10  ;;  %p500_p2 = scmp.lt.u32.totalorder %s491_s27, %s784_s18 }
  0x26   : > { %p499_p4 = por %p498_p0, %p497_p6 }
  0x27   : > { %p495_p13 = pneg %p494_p12 }
  0x28   : > { %p501_p7 = por %p500_p2, %p499_p4 }
  0x2a   : > { %p502_p9 = pnand %p501_p7, %p495_p13 }
  0x2c   : > { %505 = shalt.err (!%p502_p9)
}
  0x2d   : > { %s506_s7 = scalar_lea.vmem %s794_s21, 128  ;;  %s663_s23 = smov [#allocation2]  }
  0x2e   : > { %p507_p10 = scmp.ne.s32.totalorder %s794_s21, %s506_s7  ;;  %s511_s28 = sshll.u32 %s663_s23, 4  ;;  %s512_s28 = int_to_ptr.vmem [resolvable:$false] %s511_s28 }
  0x2f   : > { %s513_s12 = scalar_lea.vmem %s512_s28, 256  ;;  %p514_p1 = scmp.lt.s32.totalorder %s794_s21, %s512_s28 }
  0x30   : > { %p509_p12 = pnand %p507_p10, %p493_p11  ;;  %p515_p6 = scmp.lt.s32.totalorder %s513_s12, %s506_s7 }
  0x32   : > { %p510_p3 = pneg %p509_p12  ;;  %p516_p0 = por %p515_p6, %p514_p1 }
  0x34   : > { %p517_p2 = pnand %p516_p0, %p510_p3 }
  0x36   : > { %520 = shalt.err (!%p517_p2)
}
  0x37   : > { %404 = dma.hbm_to_vmem [thread:$0]  (!%p790_p5), %s784_s18, 128, %s794_s21, %s142_s26  }
  0x38   : > { %p948_p7 = scmp.lt.s32.totalorder %s661_s17, 3  ;;  %p949_p9 = scmp.ge.s32.totalorder %s661_s17, 1 }
  0x39   : > { %s837_s19 = scalar_lea.hbm %s938_s1, %s384_s6  ;;  %s951_s23 = sshll.u32 %s775_s5, 3 }
  0x3a   : > { %p828_p13 = pnand %p949_p9, %p948_p7  ;;  %s166_s28 = scalar_lea.vmem [#allocation5], %s951_s23 }
  0x3b   : > { %s176_s12 = sshll.u32 %s166_s28, 4  ;;  %s163_s18 = scalar_lea.sflag [#allocation6], %s775_s5  ;;  %s177_s12 = int_to_ptr.vmem [resolvable:$true] %s176_s12 }
  0x3c   : > { %s950_s27 = scalar_select %p828_p13, 1, 0 }
  0x3d   : > { %s521_s21 = scalar_lea.hbm %s837_s19, 128  ;;  %s526_s6 = scalar_lea.hbm %s938_s1, 256 }
  0x3e   : > { %p522_p1 = scmp.ne.s32.totalorder %s837_s19, %s521_s21  ;;  %p527_p10 = scmp.lt.u32.totalorder %s837_s19, %s938_s1 }
  0x3f   : > { %p528_p12 = scmp.lt.u32.totalorder %s526_s6, %s521_s21  ;;  %p530_p0 = scmp.lt.u32.totalorder %s521_s21, %s837_s19 }
  0x40   : > { %p524_p3 = pnand %p522_p1, %p493_p11 }
  0x41   : > { %p529_p6 = por %p528_p12, %p527_p10 }
  0x42   : > { %p525_p4 = pneg %p524_p3 }
  0x43   : > { %p531_p2 = por %p530_p0, %p529_p6 }
  0x45   : > { %p532_p7 = pnand %p531_p2, %p525_p4 }
  0x47   : > { %535 = shalt.err (!%p532_p7)
}
  0x48   : > { %s536_s5 = scalar_lea.vmem %s177_s12, 128  ;;  %s664_s23 = smov [#allocation5]  }
  0x49   : > { %p537_p9 = scmp.ne.s32.totalorder %s177_s12, %s536_s5  ;;  %s541_s28 = sshll.u32 %s664_s23, 4  ;;  %s542_s28 = int_to_ptr.vmem [resolvable:$false] %s541_s28 }
  0x4a   : > { %s543_s22 = scalar_lea.vmem %s542_s28, 256  ;;  %p544_p8 = scmp.lt.s32.totalorder %s177_s12, %s542_s28 }
  0x4b   : > { %p539_p1 = pnand %p537_p9, %p493_p11  ;;  %p545_p13 = scmp.lt.s32.totalorder %s543_s22, %s536_s5 }
  0x4d   : > { %p540_p3 = pneg %p539_p1  ;;  %p546_p10 = por %p545_p13, %p544_p8 }
  0x4f   : > { %p547_p12 = pnand %p546_p10, %p540_p3 }
  0x51   : > { %550 = shalt.err (!%p547_p12)
}
  0x52   : > { %407 = dma.hbm_to_vmem [thread:$0]  (!%p790_p5), %s837_s19, 128, %s177_s12, %s163_s18  }
  0x53   : > { %p952_p4 = scmp.ne.s32.totalorder %s950_s27, 0 }
  0x54   : > { %s187_s21 = sand.u32 (!%p952_p4), 1, %s645_s13   ;;  %p953_p11 = scmp.ne.s32.totalorder (!%p952_p4), %s944_s25, 0 }
  0x55   : > { %185 = sbr.rel (%p952_p4) target bundleno = 130 (0x82), region = 28  ;;  %s388_s26 = sshll.u32 (!%p952_p4), %s187_s21, 3 }
  0x56   : > { %s188_s6 = scalar_lea.sflag (!%p952_p4), [#allocation3], %s187_s21  ;;  %s191_s7 = scalar_lea.vmem (!%p952_p4), [#allocation2], %s388_s26 }
  0x5c   : > { %616 = dma.done.wait (%p953_p11), %s188_s6, 128  }
  0x5d   : > { %618 = vsyncadd (%p953_p11), %s188_s6, 4294967168  ;;  %s197_s8 = scalar_lea.sflag [#allocation6], %s187_s21  ;;  %s200_s5 = scalar_lea.vmem [#allocation5], %s388_s26 }
  0x5e   : > { %620 = dma.done.wait (%p953_p11), %s197_s8, 128  }
  0x5f   : > { %622 = vsyncadd (%p953_p11), %s197_s8, 4294967168  ;;  %s223_s24 = sand.u32 1, %s633_s10   ;;  %v239_v0 = vld [vmem:[%s191_s7] sm:$0xff]  ;;  %v240_v1 = vld [vmem:[%s200_s5] sm:$0xff]  ;;  %s394_s12 = smul.u32 384, %s653_s15 }
  0x60   : > { %s393_s27 = smul.u32 24, %s223_s24  ;;  %v241_v2 = vmul.f32 0.5, %v239_v0  ;;  %s881_s22 = scalar_lea.sflag [#allocation4], %s223_s24 }
  0x61   : > { %s877_s28 = scalar_lea.hbm %s939_s2, %s394_s12  ;;  %p954_p5 = scmp.ne.s32.totalorder %s945_s3, 0 }
  0x62   : > { %489 = vtanh.f32 %v241_v2  ;;  %s225_s19 = scalar_lea.vmem [#allocation7], %s393_s27  ;;  %s665_s15 = smov [#allocation7]  }
  0x63   : > { %260 = vst [vmem:[%s225_s19 + $0x10] sm:$0xff] %v240_v1  ;;  %s275_s18 = sshll.u32 %s225_s19, 4  ;;  %s555_s26 = sshll.u32 %s665_s15, 4  ;;  %s879_s18 = int_to_ptr.vmem [resolvable:$true] %s275_s18  ;;  %s556_s26 = int_to_ptr.vmem [resolvable:$false] %s555_s26 }
  0x64   : > { %s551_s21 = scalar_lea.vmem %s879_s18, 384  ;;  %s557_s6 = scalar_lea.vmem %s556_s26, 768 }
  0x65   : > { %p552_p8 = scmp.ne.s32.totalorder %s879_s18, %s551_s21  ;;  %p558_p0 = scmp.lt.s32.totalorder %s879_s18, %s556_s26 }
  0x66   : > { %p559_p2 = scmp.lt.s32.totalorder %s557_s6, %s551_s21 }
  0x67   : > { %p553_p13 = pnand %p552_p8, %p954_p5 }
  0x68   : > { %p560_p7 = por %p559_p2, %p558_p0 }
  0x69   : > { %p554_p6 = pneg %p553_p13 }
  0x6b   : > { %p561_p9 = pnand %p560_p7, %p554_p6 }
  0x6c   : > { %v490_v3 = vpop.eup %489 }
  0x6d   : > { %v243_v4 = vmul.f32 0.5, %v490_v3 }
  0x6f   : > { %v244_v5 = vadd.f32 0.5, %v243_v4 }
  0x71   : > { %v245_v6 = vmul.f32 %v244_v5, %v240_v1  ;;  %257 = vst [vmem:[%s225_s19 + $0x8] sm:$0xff] %v244_v5 }
  0x73   : > { %254 = vst [vmem:[%s225_s19] sm:$0xff] %v245_v6 }
  0x74   : > { %564 = shalt.err (!%p561_p9)
}
  0x75   : > { %s565_s7 = scalar_lea.hbm %s877_s28, 384  ;;  %s569_s24 = scalar_lea.hbm %s939_s2, 768 }
  0x76   : > { %p566_p1 = scmp.ne.s32.totalorder %s877_s28, %s565_s7  ;;  %p570_p12 = scmp.lt.u32.totalorder %s877_s28, %s939_s2 }
  0x77   : > { %p571_p4 = scmp.lt.u32.totalorder %s569_s24, %s565_s7  ;;  %p573_p8 = scmp.lt.u32.totalorder %s565_s7, %s877_s28 }
  0x78   : > { %p567_p3 = pnand %p566_p1, %p954_p5 }
  0x79   : > { %p572_p11 = por %p571_p4, %p570_p12 }
  0x7a   : > { %p568_p10 = pneg %p567_p3 }
  0x7b   : > { %p574_p13 = por %p573_p8, %p572_p11 }
  0x7d   : > { %p575_p6 = pnand %p574_p13, %p568_p10 }
  0x7f   : > { %578 = shalt.err (!%p575_p6)
}
  0x80   : > { %s666_s12 = smov 128   ;;  %s667_s23 = smov 8  }
  0x81   : > { %399 = dma.vmem_to_hbm [thread:$0]  (%p954_p5), %s879_s18, 384, %s877_s28, %s881_s22, %s666_s12, %s666_s12, %s667_s23  }
  0x82 PF: > { %s290_s25 = sand.u32 1, %s629_s9   ;;  %p955_p0 = scmp.ne.s32.totalorder %s946_s4, 0 }
  0x83   : > { %p956_p2 = scmp.ge.s32.totalorder %s661_s17, 2  ;;  %s291_s21 = scalar_lea.sflag [#allocation4], %s290_s25 }
  0x85   : > { %p409_p7 = pnand %p956_p2, %p955_p0 }
  0x87   : > { %624 = dma.done.wait (!%p409_p7), %s291_s21, 384  }
  0x88   : > { %626 = vsyncadd (!%p409_p7), %s291_s21, 4294966912  ;;  %s21_s17 = sadd.s32 1, %s661_s17   ;;  %s957_s9 = smov %s633_s10 }
  0x89   : > { %p18_p9 = scmp.ge.s32.totalorder %s21_s17, 4   ;;  %s958_s10 = smov %s637_s11 }
  0x8a   : > { %s959_s11 = smov %s755_s29  ;;  %s960_s12 = smov %s645_s13 }
  0x8b   : > { %s961_s13 = smov %s649_s14  ;;  %s962_s14 = smov %s758_s30 }
  0x8c   : > { %s963_s15 = smov %s657_s16  ;;  %s964_s16 = smov %s966_s20 }
  0x8d   :  { %20 = sbr.rel (!%p18_p9) target bundleno = 10 (0xa), region = 90 }
  0x94   :  { %296 = vsyncpa [#allocation3], 1 }
  0x95   :  { %298 = vsyncpa [#allocation3 + $0x1], 1 }
  0x96   :  { %299 = vsyncpa [#allocation6], 1 }
  0x97   :  { %301 = vsyncpa [#allocation6 + $0x1], 1 }
  0x98   :  { %302 = vsyncpa [#allocation4], 1 }
  0x99   :  { %304 = vsyncpa [#allocation4 + $0x1], 1 }

</bundles_post_ra>
